<compile_context>
chip_gen: v7x
topology: tpu7x:2x2x1
jax: 0.10.0
libtpu: 0.0.40
codegen_flags: <defaults>
</compile_context>

<pallas_src>
import functools

import jax
import jax.numpy as jnp
from jax.experimental import pallas as pl
from jax.experimental.pallas import tpu as pltpu

HIDDEN1 = 128
HIDDEN2 = 128
HIDDEN3 = 64          # logical fc3 width
PAD_H3 = 128          # lane-dense padded fc3 width (K dim of the last matmul)


def dqn_kernel(x_ref,
               w1_ref, b1_ref,
               w2_ref, b2_ref,
               w3_ref, b3_ref,
               w4_ref, b4_ref,
               out_ref):
    # Cast activations to bf16 in-kernel (VPU slots are idle under the MXU work;
    # avoids a separate HBM cast pass in the wrapper).
    x = x_ref[...].astype(jnp.bfloat16)

    # fc1 + ReLU (bf16 MXU, f32 accumulate, f32 bias/ReLU)
    h = jnp.dot(x, w1_ref[...], preferred_element_type=jnp.float32) + b1_ref[...]
    h = jnp.maximum(h, 0.0)

    # fc2 + ReLU
    h = jnp.dot(h.astype(jnp.bfloat16), w2_ref[...],
                preferred_element_type=jnp.float32) + b2_ref[...]
    h = jnp.maximum(h, 0.0)

    # fc3 + ReLU (padded to 128 lanes; pad cols are relu(0 + 0) = 0)
    h = jnp.dot(h.astype(jnp.bfloat16), w3_ref[...],
                preferred_element_type=jnp.float32) + b3_ref[...]
    h = jnp.maximum(h, 0.0)

    # out (no activation; output width padded only to 8 sublanes -> tiny writeback)
    y = jnp.dot(h.astype(jnp.bfloat16), w4_ref[...],
                preferred_element_type=jnp.float32) + b4_ref[...]
    out_ref[...] = y.astype(out_ref.dtype)


def _pad_to(a, shape):
    return jnp.pad(a, tuple((0, t - s) for s, t in zip(a.shape, shape)))


def _round_up(x, m):
    return ((x + m - 1) // m) * m


def _select_tb(batch, tb_max):
    """Pick the batch tile: one tile for small batches, otherwise big (>=256-aligned)
    tiles, preferring exactly two tiles for medium batches so both v7x cores get work."""
    b16 = _round_up(batch, 16)          # bf16 sublane packing
    if b16 <= 512:
        return b16                      # single small tile, negligible padding
    return min(tb_max, _round_up((b16 + 1) // 2, 256))


@functools.partial(jax.jit, static_argnames=("tb",))
def dqn_forward(x, params, *, tb=2048):
    """x: (B, state_dim) float32. params: dict of (in, out) weights and (1, out) biases."""
    B, S = x.shape
    action_dim = params["w4"].shape[1]
    out_pad = _round_up(max(action_dim, 8), 8)   # sublane-aligned narrow output width

    # --- batch tiling ---
    TB = _select_tb(B, tb)
    B_pad = _round_up(B, TB)
    grid_b = B_pad // TB

    x_p = x if B_pad == B else jnp.pad(x, ((0, B_pad - B), (0, 0)))   # stays f32

    # --- parameters: bf16 weights, f32 biases; zero padding => semantics unchanged ---
    w1 = params["w1"].astype(jnp.bfloat16)                                  # (S, 128)
    b1 = params["b1"].astype(jnp.float32)                                   # (1, 128)
    w2 = params["w2"].astype(jnp.bfloat16)                                  # (128, 128)
    b2 = params["b2"].astype(jnp.float32)                                   # (1, 128)
    w3 = _pad_to(params["w3"], (HIDDEN2, PAD_H3)).astype(jnp.bfloat16)      # (128, 128)
    b3 = _pad_to(params["b3"], (1, PAD_H3)).astype(jnp.float32)             # (1, 128)
    w4 = _pad_to(params["w4"], (PAD_H3, out_pad)).astype(jnp.bfloat16)      # (128, 8)
    b4 = _pad_to(params["b4"], (1, out_pad)).astype(jnp.float32)            # (1, 8)

    # weights/biases: same block for every grid step -> fetched once, kept resident
    resident = lambda a: pl.BlockSpec(a.shape, lambda i: (0, 0))

    flops = 2 * B_pad * (S * HIDDEN1 + HIDDEN1 * HIDDEN2
                         + HIDDEN2 * PAD_H3 + PAD_H3 * out_pad)
    param_bytes = (S * HIDDEN1 + HIDDEN1 * HIDDEN2
                   + HIDDEN2 * PAD_H3 + PAD_H3 * out_pad) * 2 \
                  + (HIDDEN1 + HIDDEN2 + PAD_H3 + out_pad) * 4
    bytes_accessed = B_pad * (S * 4 + out_pad * 4) + param_bytes

    out_padded = pl.pallas_call(
        dqn_kernel,
        out_shape=jax.ShapeDtypeStruct((B_pad, out_pad), jnp.float32),
        grid=(grid_b,),
        in_specs=[
            pl.BlockSpec((TB, S), lambda i: (i, 0)),    # activations stream per tile
            resident(w1), resident(b1),
            resident(w2), resident(b2),
            resident(w3), resident(b3),
            resident(w4), resident(b4),
        ],
        out_specs=pl.BlockSpec((TB, out_pad), lambda i: (i, 0)),
        compiler_params=pltpu.CompilerParams(
            dimension_semantics=("parallel",)),
        cost_estimate=pl.CostEstimate(
            flops=flops, transcendentals=0, bytes_accessed=bytes_accessed),
    )(x_p, w1, b1, w2, b2, w3, b3, w4, b4)

    # strip the batch padding and the (small) lane padding of the output
    return out_padded[:B, :action_dim]


def init_params(key, state_dim, action_dim):
    """Deterministic init matching nn.Linear shapes (stored transposed: (in, out))."""
    sizes = [(state_dim, HIDDEN1), (HIDDEN1, HIDDEN2),
             (HIDDEN2, HIDDEN3), (HIDDEN3, action_dim)]
    params = {}
    for i, (fan_in, fan_out) in enumerate(sizes, start=1):
        key, kw, kb = jax.random.split(key, 3)
        bound = 1.0 / jnp.sqrt(fan_in)  # PyTorch default uniform(-1/sqrt(fan_in), +)
        params[f"w{i}"] = jax.random.uniform(
            kw, (fan_in, fan_out), jnp.float32, minval=-bound, maxval=bound)
        params[f"b{i}"] = jax.random.uniform(
            kb, (1, fan_out), jnp.float32, minval=-bound, maxval=bound)
    return params


def dqn_reference_f32(x, params):
    """Pure f32 reference (semantics of the PyTorch module)."""
    h = jnp.maximum(x @ params["w1"] + params["b1"], 0.0)
    h = jnp.maximum(h @ params["w2"] + params["b2"], 0.0)
    h = jnp.maximum(h @ params["w3"] + params["b3"], 0.0)
    return h @ params["w4"] + params["b4"]


def dqn_reference_bf16(x, params):
    """Reference with the kernel's numerics (bf16 matmul inputs, f32 accumulation)."""
    bf = jnp.bfloat16
    dot = lambda a, b: jnp.dot(a.astype(bf), b.astype(bf),
                               preferred_element_type=jnp.float32)
    h = jnp.maximum(dot(x, params["w1"]) + params["b1"], 0.0)
    h = jnp.maximum(dot(h, params["w2"]) + params["b2"], 0.0)
    h = jnp.maximum(dot(h, params["w3"]) + params["b3"], 0.0)
    return dot(h, params["w4"]) + params["b4"]


if __name__ == "__main__":
    STATE_DIM = 8    # LunarLander-v2 observation dim
    ACTION_DIM = 4   # LunarLander-v2 action dim
    BATCH = 2

    key = jax.random.PRNGKey(0)
    key, kx = jax.random.split(key)
    x = jax.random.normal(kx, (BATCH, STATE_DIM), jnp.float32)
    params = init_params(key, STATE_DIM, ACTION_DIM)

    # Small-batch path (pads batch up to one 16-row tile).
    out = jax.block_until_ready(dqn_forward(x, params))
    assert out.shape == (BATCH, ACTION_DIM)
    ref_bf16 = dqn_reference_bf16(x, params)
    ref_f32 = dqn_reference_f32(x, params)
    assert jnp.allclose(out, ref_bf16, atol=5e-3, rtol=5e-3)
    assert jnp.allclose(out, ref_f32, atol=5e-2, rtol=5e-2)

    # Medium batch: single 512-row tile, resident weights.
    key, kx2 = jax.random.split(key)
    x_mid = jax.random.normal(kx2, (512, STATE_DIM), jnp.float32)
    out_mid = jax.block_until_ready(dqn_forward(x_mid, params))
    assert out_mid.shape == (512, ACTION_DIM)
    assert jnp.allclose(out_mid, dqn_reference_bf16(x_mid, params),
                        atol=5e-3, rtol=5e-3)

    # Multi-tile path (exercises the batch grid, batch padding and big tiles).
    key, kx3 = jax.random.split(key)
    x_big = jax.random.normal(kx3, (2000, STATE_DIM), jnp.float32)
    out_big = jax.block_until_ready(dqn_forward(x_big, params))
    assert out_big.shape == (2000, ACTION_DIM)
    assert jnp.allclose(out_big, dqn_reference_bf16(x_big, params),
                        atol=5e-3, rtol=5e-3)

    print("KERNEL_OK")
</pallas_src>

<mosaic_0001>
module attributes {stable_mosaic.version = 11 : i64} {
  func.func @dqn_kernel(%arg0: i32, %arg1: memref<16x8xf32, #tpu.memory_space<vmem>>, %arg2: memref<8x128xbf16, #tpu.memory_space<vmem>>, %arg3: memref<1x128xf32, #tpu.memory_space<vmem>>, %arg4: memref<128x128xbf16, #tpu.memory_space<vmem>>, %arg5: memref<1x128xf32, #tpu.memory_space<vmem>>, %arg6: memref<128x128xbf16, #tpu.memory_space<vmem>>, %arg7: memref<1x128xf32, #tpu.memory_space<vmem>>, %arg8: memref<128x8xbf16, #tpu.memory_space<vmem>>, %arg9: memref<1x8xf32, #tpu.memory_space<vmem>>, %arg10: memref<16x8xf32, #tpu.memory_space<vmem>>) attributes {dimension_semantics = [#tpu.dimension_semantics<parallel>], iteration_bounds = array<i64: 1>, scalar_prefetch = 0 : i64, scratch_operands = 0 : i64, tpu.core_type = #tpu.core_type<tc>, window_params = [{transform_indices = @transform_0, window_bounds = array<i64: 16, 8>}, {pipeline_mode = #tpu.pipeline_mode<synchronous>, transform_indices = @transform_1, window_bounds = array<i64: 8, 128>}, {pipeline_mode = #tpu.pipeline_mode<synchronous>, transform_indices = @transform_2, window_bounds = array<i64: 1, 128>}, {pipeline_mode = #tpu.pipeline_mode<synchronous>, transform_indices = @transform_3, window_bounds = array<i64: 128, 128>}, {pipeline_mode = #tpu.pipeline_mode<synchronous>, transform_indices = @transform_4, window_bounds = array<i64: 1, 128>}, {pipeline_mode = #tpu.pipeline_mode<synchronous>, transform_indices = @transform_5, window_bounds = array<i64: 128, 128>}, {pipeline_mode = #tpu.pipeline_mode<synchronous>, transform_indices = @transform_6, window_bounds = array<i64: 1, 128>}, {pipeline_mode = #tpu.pipeline_mode<synchronous>, transform_indices = @transform_7, window_bounds = array<i64: 128, 8>}, {pipeline_mode = #tpu.pipeline_mode<synchronous>, transform_indices = @transform_8, window_bounds = array<i64: 1, 8>}, {transform_indices = @transform_9, window_bounds = array<i64: 16, 8>}]} {
    %c0 = arith.constant 0 : index
    %c0_0 = arith.constant 0 : index
    %0 = vector.load %arg1[%c0, %c0_0] : memref<16x8xf32, #tpu.memory_space<vmem>>, vector<16x8xf32>
    %1 = arith.truncf %0 : vector<16x8xf32> to vector<16x8xbf16>
    %c0_1 = arith.constant 0 : index
    %c0_2 = arith.constant 0 : index
    %2 = vector.load %arg2[%c0_1, %c0_2] : memref<8x128xbf16, #tpu.memory_space<vmem>>, vector<8x128xbf16>
    %cst = arith.constant dense<0.000000e+00> : vector<16x128xf32>
    %3 = tpu.matmul %1, %2, %cst {dimension_numbers = #tpu.dot_dimension_numbers<[1], [0], [0], [1], [0, 0, 1, 1], [], []>} : vector<16x8xbf16>, vector<8x128xbf16>, vector<16x128xf32> -> vector<16x128xf32>
    %c0_3 = arith.constant 0 : index
    %c0_4 = arith.constant 0 : index
    %4 = vector.load %arg3[%c0_3, %c0_4] : memref<1x128xf32, #tpu.memory_space<vmem>>, vector<1x128xf32>
    %5 = vector.broadcast %4 : vector<1x128xf32> to vector<16x128xf32>
    %6 = arith.addf %3, %5 : vector<16x128xf32>
    %cst_5 = arith.constant 0.000000e+00 : f32
    %7 = vector.broadcast %cst_5 : f32 to vector<16x128xf32>
    %8 = arith.maximumf %6, %7 : vector<16x128xf32>
    %9 = arith.truncf %8 : vector<16x128xf32> to vector<16x128xbf16>
    %c0_6 = arith.constant 0 : index
    %c0_7 = arith.constant 0 : index
    %10 = vector.load %arg4[%c0_6, %c0_7] : memref<128x128xbf16, #tpu.memory_space<vmem>>, vector<128x128xbf16>
    %cst_8 = arith.constant dense<0.000000e+00> : vector<16x128xf32>
    %11 = tpu.matmul %9, %10, %cst_8 {dimension_numbers = #tpu.dot_dimension_numbers<[1], [0], [0], [1], [0, 0, 1, 1], [], []>} : vector<16x128xbf16>, vector<128x128xbf16>, vector<16x128xf32> -> vector<16x128xf32>
    %c0_9 = arith.constant 0 : index
    %c0_10 = arith.constant 0 : index
    %12 = vector.load %arg5[%c0_9, %c0_10] : memref<1x128xf32, #tpu.memory_space<vmem>>, vector<1x128xf32>
    %13 = vector.broadcast %12 : vector<1x128xf32> to vector<16x128xf32>
    %14 = arith.addf %11, %13 : vector<16x128xf32>
    %cst_11 = arith.constant 0.000000e+00 : f32
    %15 = vector.broadcast %cst_11 : f32 to vector<16x128xf32>
    %16 = arith.maximumf %14, %15 : vector<16x128xf32>
    %17 = arith.truncf %16 : vector<16x128xf32> to vector<16x128xbf16>
    %c0_12 = arith.constant 0 : index
    %c0_13 = arith.constant 0 : index
    %18 = vector.load %arg6[%c0_12, %c0_13] : memref<128x128xbf16, #tpu.memory_space<vmem>>, vector<128x128xbf16>
    %cst_14 = arith.constant dense<0.000000e+00> : vector<16x128xf32>
    %19 = tpu.matmul %17, %18, %cst_14 {dimension_numbers = #tpu.dot_dimension_numbers<[1], [0], [0], [1], [0, 0, 1, 1], [], []>} : vector<16x128xbf16>, vector<128x128xbf16>, vector<16x128xf32> -> vector<16x128xf32>
    %c0_15 = arith.constant 0 : index
    %c0_16 = arith.constant 0 : index
    %20 = vector.load %arg7[%c0_15, %c0_16] : memref<1x128xf32, #tpu.memory_space<vmem>>, vector<1x128xf32>
    %21 = vector.broadcast %20 : vector<1x128xf32> to vector<16x128xf32>
    %22 = arith.addf %19, %21 : vector<16x128xf32>
    %cst_17 = arith.constant 0.000000e+00 : f32
    %23 = vector.broadcast %cst_17 : f32 to vector<16x128xf32>
    %24 = arith.maximumf %22, %23 : vector<16x128xf32>
    %25 = arith.truncf %24 : vector<16x128xf32> to vector<16x128xbf16>
    %c0_18 = arith.constant 0 : index
    %c0_19 = arith.constant 0 : index
    %26 = vector.load %arg8[%c0_18, %c0_19] : memref<128x8xbf16, #tpu.memory_space<vmem>>, vector<128x8xbf16>
    %cst_20 = arith.constant dense<0.000000e+00> : vector<16x8xf32>
    %27 = tpu.matmul %25, %26, %cst_20 {dimension_numbers = #tpu.dot_dimension_numbers<[1], [0], [0], [1], [0, 0, 1, 1], [], []>} : vector<16x128xbf16>, vector<128x8xbf16>, vector<16x8xf32> -> vector<16x8xf32>
    %c0_21 = arith.constant 0 : index
    %c0_22 = arith.constant 0 : index
    %28 = vector.load %arg9[%c0_21, %c0_22] : memref<1x8xf32, #tpu.memory_space<vmem>>, vector<1x8xf32>
    %29 = vector.broadcast %28 : vector<1x8xf32> to vector<16x8xf32>
    %30 = arith.addf %27, %29 : vector<16x8xf32>
    %c0_23 = arith.constant 0 : index
    %c0_24 = arith.constant 0 : index
    %31 = vector.load %arg10[%c0_23, %c0_24] : memref<16x8xf32, #tpu.memory_space<vmem>>, vector<16x8xf32>
    tpu.vector_store %arg10[%c0_23, %c0_24], %30 {strides = array<i32>} : memref<16x8xf32, #tpu.memory_space<vmem>>, vector<16x8xf32>,
    return
  }
  func.func @transform_0(%arg0: i32) -> (i32, i32) {
    %c0_i32 = arith.constant 0 : i32
    %c0_i32_0 = arith.constant 0 : i32
    return %arg0, %c0_i32 : i32, i32
  }
  func.func @transform_1(%arg0: i32) -> (i32, i32) {
    %c0_i32 = arith.constant 0 : i32
    %c0_i32_0 = arith.constant 0 : i32
    %c0_i32_1 = arith.constant 0 : i32
    return %c0_i32, %c0_i32_0 : i32, i32
  }
  func.func @transform_2(%arg0: i32) -> (i32, i32) {
    %c0_i32 = arith.constant 0 : i32
    %c0_i32_0 = arith.constant 0 : i32
    %c0_i32_1 = arith.constant 0 : i32
    return %c0_i32, %c0_i32_0 : i32, i32
  }
  func.func @transform_3(%arg0: i32) -> (i32, i32) {
    %c0_i32 = arith.constant 0 : i32
    %c0_i32_0 = arith.constant 0 : i32
    %c0_i32_1 = arith.constant 0 : i32
    return %c0_i32, %c0_i32_0 : i32, i32
  }
  func.func @transform_4(%arg0: i32) -> (i32, i32) {
    %c0_i32 = arith.constant 0 : i32
    %c0_i32_0 = arith.constant 0 : i32
    %c0_i32_1 = arith.constant 0 : i32
    return %c0_i32, %c0_i32_0 : i32, i32
  }
  func.func @transform_5(%arg0: i32) -> (i32, i32) {
    %c0_i32 = arith.constant 0 : i32
    %c0_i32_0 = arith.constant 0 : i32
    %c0_i32_1 = arith.constant 0 : i32
    return %c0_i32, %c0_i32_0 : i32, i32
  }
  func.func @transform_6(%arg0: i32) -> (i32, i32) {
    %c0_i32 = arith.constant 0 : i32
    %c0_i32_0 = arith.constant 0 : i32
    %c0_i32_1 = arith.constant 0 : i32
    return %c0_i32, %c0_i32_0 : i32, i32
  }
  func.func @transform_7(%arg0: i32) -> (i32, i32) {
    %c0_i32 = arith.constant 0 : i32
    %c0_i32_0 = arith.constant 0 : i32
    %c0_i32_1 = arith.constant 0 : i32
    return %c0_i32, %c0_i32_0 : i32, i32
  }
  func.func @transform_8(%arg0: i32) -> (i32, i32) {
    %c0_i32 = arith.constant 0 : i32
    %c0_i32_0 = arith.constant 0 : i32
    %c0_i32_1 = arith.constant 0 : i32
    return %c0_i32, %c0_i32_0 : i32, i32
  }
  func.func @transform_9(%arg0: i32) -> (i32, i32) {
    %c0_i32 = arith.constant 0 : i32
    %c0_i32_0 = arith.constant 0 : i32
    return %arg0, %c0_i32 : i32, i32
  }
}

</mosaic_0001>

<bundles_post_ra>
// kernel: dqn_forward.1
= control target key start
LH: loop header
LB: loop body
LE: loop exit
PB: predicated region body
PF: predicated region fallthrough
CT: control target
= control target key end

     0   :  { %vm48_vm0 = vcmask 1043456   ;;  %v594_v0 = vmov 0.0   ;;  %vm595_vm1 = vmmov 0   ;;  %vm44_vm2 = vcmask 64512   ;;  %s781_s1 = inlined_call_operand.vmem [shape: bf16[8,128], index: 1, kind: input, shape index: {}]   ;;  %s782_s0 = inlined_call_operand.vmem [shape: f32[16,8], index: 0, kind: input, shape index: {}]   ;;  %s783_s3 = inlined_call_operand.vmem [shape: bf16[128,128], index: 3, kind: input, shape index: {}]   ;;  %s784_s5 = inlined_call_operand.vmem [shape: bf16[128,128], index: 5, kind: input, shape index: {}]   ;;  %s785_s2 = inlined_call_operand.vmem [shape: f32[1,128], index: 2, kind: input, shape index: {}]   ;;  %s786_s7 = inlined_call_operand.vmem [shape: bf16[128,8], index: 7, kind: input, shape index: {}]   ;;  %s787_s4 = inlined_call_operand.vmem [shape: f32[1,128], index: 4, kind: input, shape index: {}]   ;;  %s788_s6 = inlined_call_operand.vmem [shape: f32[1,128], index: 6, kind: input, shape index: {}]   ;;  %s789_s8 = inlined_call_operand.vmem [shape: f32[1,8], index: 8, kind: input, shape index: {}]   ;;  %s790_s9 = inlined_call_operand.vmem [shape: f32[16,8], index: 9, kind: output, shape index: {}]  }
   0x1   :  { %502 = vmatprep.subr.bf16.mxu0 %v594_v0  ;;  %v36_v1 = vld [vmem:[%s781_s1] sm:$0xf]  ;;  %504 = vmatprep.mubr.msk.bf16.mxu0 %vm595_vm1, %v594_v0  ;;  %v34_v3 = vld [vmem:[%s782_s0 + $0x8] sm:$0xff]  ;;  %v572_v8 = vld [vmem:[%s783_s3 + $0x10] sm:$0xff]  }
   0x2   :  { %v33_v2 = vld [vmem:[%s782_s0] sm:$0xff]  ;;  %v50_v4 = vsel %vm48_vm0, %v36_v1, 0  ;;  %508 = vmatprep.subr.bf16.mxu1 %v594_v0  ;;  %524 = vmatprep.mubr.msk.bf16.mxu1 %vm595_vm1, %v594_v0  ;;  %v571_v7 = vld [vmem:[%s783_s3 + $0x8] sm:$0xff]   ;;  %v573_v9 = vld [vmem:[%s783_s3 + $0x18] sm:$0xff]  }
   0x3   :  { %v35_v5 = vpack.c.bf16 %v34_v3, %v33_v2  ;;  %v570_v6 = vld [vmem:[%s783_s3] sm:$0xff]   ;;  %503 = vmatpush3.bf16.msra.mxu0 %v50_v4  ;;  %v575_v11 = vld [vmem:[%s783_s3 + $0x28] sm:$0xff]   ;;  %v576_v12 = vld [vmem:[%s783_s3 + $0x30] sm:$0xff]  }
   0x4   :  { %509 = vmatpush3.bf16.msra.mxu1 %v570_v6  ;;  %528 = vmatprep.subr.bf16.mxu0 %v594_v0  ;;  %v574_v10 = vld [vmem:[%s783_s3 + $0x20] sm:$0xff]   ;;  %v577_v13 = vld [vmem:[%s783_s3 + $0x38] sm:$0xff]   ;;  %v579_v15 = vld [vmem:[%s784_s5 + $0x8] sm:$0xff]  }
   0x5   :  { %510 = vmatprep.subr.bf16.mxu1 %v594_v0  ;;  %v578_v14 = vld [vmem:[%s784_s5] sm:$0xff]   ;;  %v580_v16 = vld [vmem:[%s784_s5 + $0x10] sm:$0xff]   ;;  %v581_v17 = vld [vmem:[%s784_s5 + $0x18] sm:$0xff]  }
   0x6   :  { %505 = vmatmul.mubr.msk.bf16.vlgmr.msra.gmra.mrb[0].mxu0 %vm44_vm2, %v35_v5  ;;  %v582_v18 = vld [vmem:[%s784_s5 + $0x20] sm:$0xff]   ;;  %v583_v19 = vld [vmem:[%s784_s5 + $0x28] sm:$0xff]   ;;  %v584_v30 = vld [vmem:[%s784_s5 + $0x30] sm:$0xff]  }
   0x7   :  { %544 = vmatprep.mubr.msk.bf16.mxu0 %vm595_vm1, %v594_v0  ;;  %529 = vmatpush3.bf16.msra.mxu0 %v578_v14  ;;  %v444_v20 = vld [vmem:[%s785_s2] ss:$0 sm:$0xff]  ;;  %v585_v31 = vld [vmem:[%s784_s5 + $0x38] sm:$0xff]   ;;  %v587_v33 = vld [vmem:[%s786_s7 + $0x8] sm:$0xff]  }
   0x8   :  { %511 = vmatpush3.bf16.msra.mxu1 %v571_v7  ;;  %530 = vmatprep.subr.bf16.mxu0 %v594_v0  ;;  %v586_v32 = vld [vmem:[%s786_s7] sm:$0xff]   ;;  %v588_v34 = vld [vmem:[%s786_s7 + $0x10] sm:$0xff]   ;;  %v589_v35 = vld [vmem:[%s786_s7 + $0x18] sm:$0xff]  }
   0x9   :  { %512 = vmatprep.subr.bf16.mxu1 %v594_v0  ;;  %v590_v36 = vld [vmem:[%s786_s7 + $0x20] sm:$0xff]   ;;  %v591_v37 = vld [vmem:[%s786_s7 + $0x28] sm:$0xff]   ;;  %v592_v48 = vld [vmem:[%s786_s7 + $0x30] sm:$0xff]  }
   0xa   :  { %v446_v38 = vld [vmem:[%s787_s4] ss:$0 sm:$0xff]  ;;  %v593_v49 = vld [vmem:[%s786_s7 + $0x38] sm:$0xff]  }
   0xb   :  { %531 = vmatpush3.bf16.msra.mxu0 %v579_v15  ;;  %v455_v50 = vld [vmem:[%s788_s6] ss:$0 sm:$0xff] }
   0xc   :  { %513 = vmatpush3.bf16.msra.mxu1 %v572_v8  ;;  %532 = vmatprep.subr.bf16.mxu0 %v594_v0  ;;  %v464_v60 = vld [vmem:[%s789_s8] ss:$0 sm:$0xff] }
   0xd   :  { %514 = vmatprep.subr.bf16.mxu1 %v594_v0 }
   0xf   :  { %533 = vmatpush3.bf16.msra.mxu0 %v580_v16 }
  0x10   :  { %515 = vmatpush3.bf16.msra.mxu1 %v573_v9  ;;  %534 = vmatprep.subr.bf16.mxu0 %v594_v0 }
  0x11   :  { %516 = vmatprep.subr.bf16.mxu1 %v594_v0 }
  0x13   :  { %535 = vmatpush3.bf16.msra.mxu0 %v581_v17 }
  0x14   :  { %517 = vmatpush3.bf16.msra.mxu1 %v574_v10  ;;  %536 = vmatprep.subr.bf16.mxu0 %v594_v0 }
  0x15   :  { %518 = vmatprep.subr.bf16.mxu1 %v594_v0 }
  0x17   :  { %537 = vmatpush3.bf16.msra.mxu0 %v582_v18 }
  0x18   :  { %519 = vmatpush3.bf16.msra.mxu1 %v575_v11  ;;  %538 = vmatprep.subr.bf16.mxu0 %v594_v0 }
  0x19   :  { %520 = vmatprep.subr.bf16.mxu1 %v594_v0 }
  0x1b   :  { %539 = vmatpush3.bf16.msra.mxu0 %v583_v19 }
  0x1c   :  { %521 = vmatpush3.bf16.msra.mxu1 %v576_v12  ;;  %540 = vmatprep.subr.bf16.mxu0 %v594_v0 }
  0x1d   :  { %522 = vmatprep.subr.bf16.mxu1 %v594_v0 }
  0x1f   :  { %541 = vmatpush3.bf16.msra.mxu0 %v584_v30 }
  0x20   :  { %523 = vmatpush3.bf16.msra.mxu1 %v577_v13  ;;  %542 = vmatprep.subr.bf16.mxu0 %v594_v0 }
  0x21   :  { %548 = vmatprep.subr.bf16.mxu1 %v594_v0 }
  0x23   :  { %543 = vmatpush3.bf16.msra.mxu0 %v585_v31 }
  0xd9   :  { %v86_v21 = vpop.f32.mrb[0].mxu0 }
  0xda   :  { %v87_v22 = vadd.f32 %v444_v20, %v86_v21  ;;  %v506_v23 = vpop.f32.mrb[1].mxu0 }
  0xdb   :  { %v89_v24 = vpop.f32.mrb[2].mxu0 }
  0xdc   :  { %v90_v25 = vadd.f32 %v444_v20, %v89_v24  ;;  %v507_v26 = vpop.f32.mrb[3].mxu0  ;;  %v93_v27 = vmax.f32 %v87_v22, 0.0 }
  0xde   :  { %v94_v28 = vmax.f32 %v90_v25, 0.0 }
  0xe0   :  { %v95_v29 = vpack.c.bf16 %v94_v28, %v93_v27 }
  0xe2   :  { %525 = vmatmul.mubr.bf16.vlgmr.msra.gmra.mrb[0].mxu1 %v95_v29 }
  0xe3   :  { %564 = vmatprep.mubr.msk.bf16.mxu1 %vm595_vm1, %v594_v0  ;;  %549 = vmatpush3.bf16.msra.mxu1 %v586_v32 }
  0xe4   :  { %550 = vmatprep.subr.bf16.mxu1 %v594_v0 }
  0xe7   :  { %551 = vmatpush3.bf16.msra.mxu1 %v587_v33 }
  0xe8   :  { %552 = vmatprep.subr.bf16.mxu1 %v594_v0 }
  0xeb   :  { %553 = vmatpush3.bf16.msra.mxu1 %v588_v34 }
  0xec   :  { %554 = vmatprep.subr.bf16.mxu1 %v594_v0 }
  0xef   :  { %555 = vmatpush3.bf16.msra.mxu1 %v589_v35 }
  0xf0   :  { %556 = vmatprep.subr.bf16.mxu1 %v594_v0 }
  0xf3   :  { %557 = vmatpush3.bf16.msra.mxu1 %v590_v36 }
  0xf4   :  { %558 = vmatprep.subr.bf16.mxu1 %v594_v0 }
  0xf7   :  { %559 = vmatpush3.bf16.msra.mxu1 %v591_v37 }
  0xf8   :  { %560 = vmatprep.subr.bf16.mxu1 %v594_v0 }
  0xfb   :  { %561 = vmatpush3.bf16.msra.mxu1 %v592_v48 }
  0xfc   :  { %562 = vmatprep.subr.bf16.mxu1 %v594_v0 }
  0xff   :  { %563 = vmatpush3.bf16.msra.mxu1 %v593_v49 }
 0x1b5   :  { %v201_v39 = vpop.f32.mrb[0].mxu1 }
 0x1b6   :  { %v202_v40 = vadd.f32 %v446_v38, %v201_v39  ;;  %v526_v41 = vpop.f32.mrb[1].mxu1 }
 0x1b7   :  { %v204_v42 = vpop.f32.mrb[2].mxu1 }
 0x1b8   :  { %v205_v43 = vadd.f32 %v446_v38, %v204_v42  ;;  %v527_v44 = vpop.f32.mrb[3].mxu1  ;;  %v208_v45 = vmax.f32 %v202_v40, 0.0 }
 0x1ba   :  { %v209_v46 = vmax.f32 %v205_v43, 0.0 }
 0x1bc   :  { %v210_v47 = vpack.c.bf16 %v209_v46, %v208_v45 }
 0x1be   :  { %545 = vmatmul.mubr.bf16.vlgmr.msra.gmra.mrb[4].mxu0 %v210_v47 }
 0x291   :  { %v316_v51 = vpop.f32.mrb[4].mxu0 }
 0x292   :  { %v317_v52 = vadd.f32 %v455_v50, %v316_v51  ;;  %v546_v53 = vpop.f32.mrb[5].mxu0 }
 0x293   :  { %v319_v54 = vpop.f32.mrb[6].mxu0 }
 0x294   :  { %v320_v55 = vadd.f32 %v455_v50, %v319_v54  ;;  %v547_v56 = vpop.f32.mrb[7].mxu0  ;;  %v323_v57 = vmax.f32 %v317_v52, 0.0 }
 0x296   :  { %v324_v58 = vmax.f32 %v320_v55, 0.0 }
 0x298   :  { %v325_v59 = vpack.c.bf16 %v324_v58, %v323_v57 }
 0x29a   :  { %565 = vmatmul.mubr.bf16.vlgmr.msra.gmra.mrb[4].mxu1 %v325_v59 }
 0x36d   :  { %v431_v61 = vpop.f32.mrb[4].mxu1 }
 0x36e   :  { %v432_v62 = vadd.f32 %v464_v60, %v431_v61  ;;  %v566_v63 = vpop.f32.mrb[5].mxu1 }
 0x36f   :  { %v434_v0 = vpop.f32.mrb[6].mxu1 }
 0x370   :  { %438 = vst.msk [vmem:[%s790_s9] sm:$0xff] %vm44_vm2, %v432_v62  ;;  %v435_v1 = vadd.f32 %v464_v60, %v434_v0  ;;  %v567_v2 = vpop.f32.mrb[7].mxu1 }
 0x372   :  { %439 = vst.msk [vmem:[%s790_s9 + $0x8] sm:$0xff] %vm44_vm2, %v435_v1 }

</bundles_post_ra>
